<compile_context>
chip_gen: v6e
topology: v6e:2x2x1
jax: 0.10.0
libtpu: 0.0.40
codegen_flags: <defaults>
</compile_context>

<pallas_src>
import jax
import jax.numpy as jnp
from jax.experimental import pallas as pl
from jax.experimental.pallas import tpu as pltpu

INPUT_SIZE = 16          # vocab size
HIDDEN = 32              # hidden_size
NUM_LAYERS = 5           # matches the module
GATES = 4 * HIDDEN       # lane-packed gate width (r | z | n | pad) = 128


def gru_seq_kernel(tok_ref, emb_ref, h0_ref, wih_ref, bx_ref, whh_ref, bh_ref,
                   out_ref, hn_ref):
    """One time step of the whole 5-layer GRU per grid iteration (batch=1).

    hn_ref (L, H) has a constant index_map -> it stays VMEM-resident across all
    grid steps and doubles as the carried per-layer hidden state.
    """
    H, L = HIDDEN, NUM_LAYERS
    t = pl.program_id(0)

    @pl.when(t == 0)
    def _init():
        # hidden.expand(num_layers, 1, H): every layer starts from the same h0.
        hn_ref[...] = jnp.broadcast_to(h0_ref[...], (L, H))

    h_prev = hn_ref[...]                                    # (L, H) state from step t-1
    tok = tok_ref[t]                                        # token id (SMEM scalar)
    x = emb_ref[pl.ds(tok, 1), :]                           # (1, H) embedded input

    # Hidden-side gates for ALL layers, hoisted OFF the serial layer chain:
    # each depends only on the previous step's state, so these L dots can issue
    # back-to-back and overlap with the dependent chain below.
    gh = []
    for l in range(L):
        gh.append(jnp.dot(h_prev[l:l + 1, :], whh_ref[l],
                          preferred_element_type=jnp.float32) + bh_ref[l])  # (1, 128)

    # Serial layer chain: only the x-side dot + gate math per layer.
    for l in range(L):
        gx = jnp.dot(x, wih_ref[l],
                     preferred_element_type=jnp.float32) + bx_ref[l]        # (1, 128)

        # One sigmoid over the combined r|z region (64 lanes).
        rz = jax.nn.sigmoid(gx[:, 0:2 * H] + gh[l][:, 0:2 * H])             # (1, 64)
        r = rz[:, 0:H]
        z = rz[:, H:2 * H]
        n = jnp.tanh(gx[:, 2 * H:3 * H] + r * gh[l][:, 2 * H:3 * H])        # (1, H)

        h_new = (1.0 - z) * n + z * h_prev[l:l + 1, :]                      # (1, H)
        hn_ref[pl.ds(l, 1), :] = h_new                      # direct per-row store
        x = h_new                                           # feeds next layer

    # Top layer's hidden is this step's GRU output.
    out_ref[pl.ds(t, 1), :] = x.astype(out_ref.dtype)


def encoder_rnn_forward_seq(tokens, hidden, packed):
    """Fused-sequence forward: tokens (1, T) int32, hidden (1, 1, H).

    Returns (outputs (1, T, H), hidden_n (num_layers, 1, H)).
    """
    H, L = HIDDEN, NUM_LAYERS
    T = tokens.shape[1]
    tok = tokens.reshape(T).astype(jnp.int32)
    h0 = hidden.reshape(1, H).astype(jnp.float32)

    out, hn = pl.pallas_call(
        gru_seq_kernel,
        out_shape=(jax.ShapeDtypeStruct((T, H), jnp.float32),
                   jax.ShapeDtypeStruct((L, H), jnp.float32)),
        grid_spec=pltpu.PrefetchScalarGridSpec(
            num_scalar_prefetch=1,                       # token ids -> SMEM
            grid=(T,),                                   # fused time-step loop
            in_specs=[
                pl.BlockSpec((INPUT_SIZE, H), lambda t, tok: (0, 0)),     # embedding table (2 KB)
                pl.BlockSpec((1, H), lambda t, tok: (0, 0)),              # initial hidden
                pl.BlockSpec((L, H, GATES), lambda t, tok: (0, 0, 0)),    # W_ih packed (80 KB)
                pl.BlockSpec((L, 1, GATES), lambda t, tok: (0, 0, 0)),    # b_x packed
                pl.BlockSpec((L, H, GATES), lambda t, tok: (0, 0, 0)),    # W_hh packed (80 KB)
                pl.BlockSpec((L, 1, GATES), lambda t, tok: (0, 0, 0)),    # b_h packed
            ],
            out_specs=[
                pl.BlockSpec((T, H), lambda t, tok: (0, 0)),              # per-step outputs (resident)
                pl.BlockSpec((L, H), lambda t, tok: (0, 0)),              # carried hidden state
            ],
        ),
        compiler_params=pltpu.CompilerParams(
            dimension_semantics=("arbitrary",),          # recurrent axis
        ),
    )(tok, packed["embedding"], h0, packed["wih"], packed["bx"],
      packed["whh"], packed["bh"])

    return out.reshape(1, T, H), hn.reshape(L, 1, H)


def encoder_rnn_forward(token, hidden, packed):
    """Mirrors EncoderRNN.forward exactly: token (1,1) int, hidden (1,1,H)."""
    out, hn = encoder_rnn_forward_seq(token.reshape(1, 1), hidden, packed)
    return out.reshape(1, 1, HIDDEN), hn


def init_params(key, input_size=INPUT_SIZE, hidden=HIDDEN, layers=NUM_LAYERS):
    """Deterministic synthetic parameters (PyTorch-style U(-1/sqrt(H), 1/sqrt(H)))."""
    k_emb, k_wih, k_whh, k_bih, k_bhh = jax.random.split(key, 5)
    bound = 1.0 / jnp.sqrt(jnp.float32(hidden))
    u = lambda k, shape: jax.random.uniform(k, shape, jnp.float32, -bound, bound)
    return {
        "embedding": jax.random.normal(k_emb, (input_size, hidden), jnp.float32),
        # (L, 3, H_in, H_out): pre-transposed W_ih / W_hh, gate order r, z, n.
        "wih": u(k_wih, (layers, 3, hidden, hidden)),
        "whh": u(k_whh, (layers, 3, hidden, hidden)),
        "bih": u(k_bih, (layers, 3, 1, hidden)),
        "bhh": u(k_bhh, (layers, 3, 1, hidden)),
    }


def pack_params(params):
    """One-time layout plumbing: lane-pack gates to 128 lanes, pre-sum r/z biases."""
    wih, whh = params["wih"], params["whh"]                 # (L, 3, H, H), gate order r, z, n
    bih, bhh = params["bih"], params["bhh"]                 # (L, 3, 1, H)
    L_, _, H_, _ = wih.shape
    pad_w = jnp.zeros((L_, H_, H_), jnp.float32)
    pad_b = jnp.zeros((L_, 1, H_), jnp.float32)
    wih_p = jnp.concatenate([wih[:, 0], wih[:, 1], wih[:, 2], pad_w], axis=-1)   # (L, H, 4H)
    whh_p = jnp.concatenate([whh[:, 0], whh[:, 1], whh[:, 2], pad_w], axis=-1)   # (L, H, 4H)
    bx_p = jnp.concatenate([bih[:, 0] + bhh[:, 0],
                            bih[:, 1] + bhh[:, 1],
                            bih[:, 2], pad_b], axis=-1)                          # (L, 1, 4H)
    bh_p = jnp.concatenate([pad_b, pad_b, bhh[:, 2], pad_b], axis=-1)            # (L, 1, 4H)
    return {"embedding": params["embedding"],
            "wih": wih_p, "bx": bx_p, "whh": whh_p, "bh": bh_p}


def reference_forward_seq(tokens, hidden, params):
    """Pure-JAX reference of the same forward pass (for verification)."""
    H, L = HIDDEN, NUM_LAYERS
    T = tokens.shape[1]
    h = jnp.broadcast_to(hidden.reshape(1, H), (L, H))
    outs = []
    for t in range(T):
        x = params["embedding"][tokens[0, t]].reshape(1, H)
        new_h = []
        for l in range(L):
            hl = h[l].reshape(1, H)
            wih, whh = params["wih"][l], params["whh"][l]
            bih, bhh = params["bih"][l], params["bhh"][l]
            gi = [x @ wih[g] + bih[g] for g in range(3)]
            gh = [hl @ whh[g] + bhh[g] for g in range(3)]
            r = jax.nn.sigmoid(gi[0] + gh[0])
            z = jax.nn.sigmoid(gi[1] + gh[1])
            n = jnp.tanh(gi[2] + r * gh[2])
            h_new = (1.0 - z) * n + z * hl
            new_h.append(h_new[0])
            x = h_new
        h = jnp.stack(new_h)
        outs.append(x[0])
    return jnp.stack(outs).reshape(1, T, H), h.reshape(L, 1, H)


if __name__ == "__main__":
    key = jax.random.PRNGKey(0)
    k_params, k_tok, k_hid, k_seq = jax.random.split(key, 4)

    params = init_params(k_params)
    packed = pack_params(params)
    hidden = jax.random.normal(k_hid, (1, 1, HIDDEN), jnp.float32)

    # --- Module-faithful single-token call: input (1, 1), hidden (1, 1, H) ---
    token = jax.random.randint(k_tok, (1, 1), 0, INPUT_SIZE, dtype=jnp.int32)
    out, hn = encoder_rnn_forward(token, hidden, packed)
    out = jax.block_until_ready(out)
    hn = jax.block_until_ready(hn)

    ref_out, ref_hn = reference_forward_seq(token, hidden, params)
    assert out.shape == (1, 1, HIDDEN) and hn.shape == (NUM_LAYERS, 1, HIDDEN)
    assert jnp.allclose(out, ref_out, atol=1e-5, rtol=1e-5)
    assert jnp.allclose(hn, ref_hn, atol=1e-5, rtol=1e-5)

    # --- Fused-sequence call (perf review): T steps in one pallas_call ---
    T = 8
    tokens = jax.random.randint(k_seq, (1, T), 0, INPUT_SIZE, dtype=jnp.int32)
    out_s, hn_s = encoder_rnn_forward_seq(tokens, hidden, packed)
    out_s = jax.block_until_ready(out_s)
    hn_s = jax.block_until_ready(hn_s)

    ref_out_s, ref_hn_s = reference_forward_seq(tokens, hidden, params)
    assert out_s.shape == (1, T, HIDDEN) and hn_s.shape == (NUM_LAYERS, 1, HIDDEN)
    assert jnp.allclose(out_s, ref_out_s, atol=1e-4, rtol=1e-4)
    assert jnp.allclose(hn_s, ref_hn_s, atol=1e-4, rtol=1e-4)

    print("KERNEL_OK")
</pallas_src>

<mosaic_0001>
module attributes {stable_mosaic.version = 11 : i64} {
  func.func @gru_seq_kernel(%arg0: i32, %arg1: memref<1xi32, #tpu.memory_space<smem>>, %arg2: memref<16x32xf32, #tpu.memory_space<vmem>>, %arg3: memref<1x32xf32, #tpu.memory_space<vmem>>, %arg4: memref<5x32x128xf32, #tpu.memory_space<vmem>>, %arg5: memref<5x1x128xf32, #tpu.memory_space<vmem>>, %arg6: memref<5x32x128xf32, #tpu.memory_space<vmem>>, %arg7: memref<5x1x128xf32, #tpu.memory_space<vmem>>, %arg8: memref<1x32xf32, #tpu.memory_space<vmem>>, %arg9: memref<5x32xf32, #tpu.memory_space<vmem>>) attributes {dimension_semantics = [#tpu.dimension_semantics<arbitrary>], iteration_bounds = array<i64: 1>, scalar_prefetch = 1 : i64, scratch_operands = 0 : i64, tpu.core_type = #tpu.core_type<tc>, window_params = [{pipeline_mode = #tpu.pipeline_mode<synchronous>, transform_indices = @transform_0, window_bounds = array<i64: 16, 32>}, {pipeline_mode = #tpu.pipeline_mode<synchronous>, transform_indices = @transform_1, window_bounds = array<i64: 1, 32>}, {pipeline_mode = #tpu.pipeline_mode<synchronous>, transform_indices = @transform_2, window_bounds = array<i64: 5, 32, 128>}, {pipeline_mode = #tpu.pipeline_mode<synchronous>, transform_indices = @transform_3, window_bounds = array<i64: 5, 1, 128>}, {pipeline_mode = #tpu.pipeline_mode<synchronous>, transform_indices = @transform_4, window_bounds = array<i64: 5, 32, 128>}, {pipeline_mode = #tpu.pipeline_mode<synchronous>, transform_indices = @transform_5, window_bounds = array<i64: 5, 1, 128>}, {pipeline_mode = #tpu.pipeline_mode<synchronous>, transform_indices = @transform_6, window_bounds = array<i64: 1, 32>}, {pipeline_mode = #tpu.pipeline_mode<synchronous>, transform_indices = @transform_7, window_bounds = array<i64: 5, 32>}]} {
    %c0_i32 = arith.constant 0 : i32
    %0 = arith.cmpi eq, %arg0, %c0_i32 : i32
    %1 = arith.extui %0 : i1 to i32
    %c0_i32_0 = arith.constant 0 : i32
    %2 = arith.cmpi ne, %1, %c0_i32_0 : i32
    scf.if %2 {
      %c0_89 = arith.constant 0 : index
      %c0_90 = arith.constant 0 : index
      %185 = vector.load %arg3[%c0_89, %c0_90] : memref<1x32xf32, #tpu.memory_space<vmem>>, vector<1x32xf32>
      %186 = vector.shape_cast %185 : vector<1x32xf32> to vector<1x32xf32>
      %187 = vector.broadcast %186 : vector<1x32xf32> to vector<5x32xf32>
      %c0_91 = arith.constant 0 : index
      %c0_92 = arith.constant 0 : index
      %188 = vector.load %arg9[%c0_91, %c0_92] : memref<5x32xf32, #tpu.memory_space<vmem>>, vector<5x32xf32>
      tpu.vector_store %arg9[%c0_91, %c0_92], %187 {strides = array<i32>} : memref<5x32xf32, #tpu.memory_space<vmem>>, vector<5x32xf32>,
    } else {
    }
    %c0 = arith.constant 0 : index
    %c0_1 = arith.constant 0 : index
    %3 = vector.load %arg9[%c0, %c0_1] : memref<5x32xf32, #tpu.memory_space<vmem>>, vector<5x32xf32>
    %4 = arith.index_cast %arg0 : i32 to index
    %5 = memref.load %arg1[%4] : memref<1xi32, #tpu.memory_space<smem>>
    %6 = arith.index_cast %5 : i32 to index
    %c0_2 = arith.constant 0 : index
    %7 = vector.load %arg2[%6, %c0_2] : memref<16x32xf32, #tpu.memory_space<vmem>>, vector<1x32xf32>
    %8 = vector.extract_strided_slice %3 {offsets = [0, 0], sizes = [1, 32], strides = [1, 1]} : vector<5x32xf32> to vector<1x32xf32>
    %c0_3 = arith.constant 0 : index
    %c0_4 = arith.constant 0 : index
    %c0_5 = arith.constant 0 : index
    %9 = vector.load %arg6[%c0_3, %c0_4, %c0_5] : memref<5x32x128xf32, #tpu.memory_space<vmem>>, vector<1x32x128xf32>
    %10 = vector.shape_cast %9 : vector<1x32x128xf32> to vector<32x128xf32>
    %cst = arith.constant dense<0.000000e+00> : vector<1x128xf32>
    %11 = tpu.matmul %8, %10, %cst {dimension_numbers = #tpu.dot_dimension_numbers<[1], [0], [0], [1], [0, 0, 1, 1], [], []>} : vector<1x32xf32>, vector<32x128xf32>, vector<1x128xf32> -> vector<1x128xf32>
    %c0_6 = arith.constant 0 : index
    %c0_7 = arith.constant 0 : index
    %c0_8 = arith.constant 0 : index
    %12 = vector.load %arg7[%c0_6, %c0_7, %c0_8] : memref<5x1x128xf32, #tpu.memory_space<vmem>>, vector<1x1x128xf32>
    %13 = vector.shape_cast %12 : vector<1x1x128xf32> to vector<1x128xf32>
    %14 = arith.addf %11, %13 : vector<1x128xf32>
    %15 = vector.extract_strided_slice %3 {offsets = [1, 0], sizes = [1, 32], strides = [1, 1]} : vector<5x32xf32> to vector<1x32xf32>
    %c1 = arith.constant 1 : index
    %c0_9 = arith.constant 0 : index
    %c0_10 = arith.constant 0 : index
    %16 = vector.load %arg6[%c1, %c0_9, %c0_10] : memref<5x32x128xf32, #tpu.memory_space<vmem>>, vector<1x32x128xf32>
    %17 = vector.shape_cast %16 : vector<1x32x128xf32> to vector<32x128xf32>
    %cst_11 = arith.constant dense<0.000000e+00> : vector<1x128xf32>
    %18 = tpu.matmul %15, %17, %cst_11 {dimension_numbers = #tpu.dot_dimension_numbers<[1], [0], [0], [1], [0, 0, 1, 1], [], []>} : vector<1x32xf32>, vector<32x128xf32>, vector<1x128xf32> -> vector<1x128xf32>
    %c1_12 = arith.constant 1 : index
    %c0_13 = arith.constant 0 : index
    %c0_14 = arith.constant 0 : index
    %19 = vector.load %arg7[%c1_12, %c0_13, %c0_14] : memref<5x1x128xf32, #tpu.memory_space<vmem>>, vector<1x1x128xf32>
    %20 = vector.shape_cast %19 : vector<1x1x128xf32> to vector<1x128xf32>
    %21 = arith.addf %18, %20 : vector<1x128xf32>
    %22 = vector.extract_strided_slice %3 {offsets = [2, 0], sizes = [1, 32], strides = [1, 1]} : vector<5x32xf32> to vector<1x32xf32>
    %c2 = arith.constant 2 : index
    %c0_15 = arith.constant 0 : index
    %c0_16 = arith.constant 0 : index
    %23 = vector.load %arg6[%c2, %c0_15, %c0_16] : memref<5x32x128xf32, #tpu.memory_space<vmem>>, vector<1x32x128xf32>
    %24 = vector.shape_cast %23 : vector<1x32x128xf32> to vector<32x128xf32>
    %cst_17 = arith.constant dense<0.000000e+00> : vector<1x128xf32>
    %25 = tpu.matmul %22, %24, %cst_17 {dimension_numbers = #tpu.dot_dimension_numbers<[1], [0], [0], [1], [0, 0, 1, 1], [], []>} : vector<1x32xf32>, vector<32x128xf32>, vector<1x128xf32> -> vector<1x128xf32>
    %c2_18 = arith.constant 2 : index
    %c0_19 = arith.constant 0 : index
    %c0_20 = arith.constant 0 : index
    %26 = vector.load %arg7[%c2_18, %c0_19, %c0_20] : memref<5x1x128xf32, #tpu.memory_space<vmem>>, vector<1x1x128xf32>
    %27 = vector.shape_cast %26 : vector<1x1x128xf32> to vector<1x128xf32>
    %28 = arith.addf %25, %27 : vector<1x128xf32>
    %29 = vector.extract_strided_slice %3 {offsets = [3, 0], sizes = [1, 32], strides = [1, 1]} : vector<5x32xf32> to vector<1x32xf32>
    %c3 = arith.constant 3 : index
    %c0_21 = arith.constant 0 : index
    %c0_22 = arith.constant 0 : index
    %30 = vector.load %arg6[%c3, %c0_21, %c0_22] : memref<5x32x128xf32, #tpu.memory_space<vmem>>, vector<1x32x128xf32>
    %31 = vector.shape_cast %30 : vector<1x32x128xf32> to vector<32x128xf32>
    %cst_23 = arith.constant dense<0.000000e+00> : vector<1x128xf32>
    %32 = tpu.matmul %29, %31, %cst_23 {dimension_numbers = #tpu.dot_dimension_numbers<[1], [0], [0], [1], [0, 0, 1, 1], [], []>} : vector<1x32xf32>, vector<32x128xf32>, vector<1x128xf32> -> vector<1x128xf32>
    %c3_24 = arith.constant 3 : index
    %c0_25 = arith.constant 0 : index
    %c0_26 = arith.constant 0 : index
    %33 = vector.load %arg7[%c3_24, %c0_25, %c0_26] : memref<5x1x128xf32, #tpu.memory_space<vmem>>, vector<1x1x128xf32>
    %34 = vector.shape_cast %33 : vector<1x1x128xf32> to vector<1x128xf32>
    %35 = arith.addf %32, %34 : vector<1x128xf32>
    %36 = vector.extract_strided_slice %3 {offsets = [4, 0], sizes = [1, 32], strides = [1, 1]} : vector<5x32xf32> to vector<1x32xf32>
    %c4 = arith.constant 4 : index
    %c0_27 = arith.constant 0 : index
    %c0_28 = arith.constant 0 : index
    %37 = vector.load %arg6[%c4, %c0_27, %c0_28] : memref<5x32x128xf32, #tpu.memory_space<vmem>>, vector<1x32x128xf32>
    %38 = vector.shape_cast %37 : vector<1x32x128xf32> to vector<32x128xf32>
    %cst_29 = arith.constant dense<0.000000e+00> : vector<1x128xf32>
    %39 = tpu.matmul %36, %38, %cst_29 {dimension_numbers = #tpu.dot_dimension_numbers<[1], [0], [0], [1], [0, 0, 1, 1], [], []>} : vector<1x32xf32>, vector<32x128xf32>, vector<1x128xf32> -> vector<1x128xf32>
    %c4_30 = arith.constant 4 : index
    %c0_31 = arith.constant 0 : index
    %c0_32 = arith.constant 0 : index
    %40 = vector.load %arg7[%c4_30, %c0_31, %c0_32] : memref<5x1x128xf32, #tpu.memory_space<vmem>>, vector<1x1x128xf32>
    %41 = vector.shape_cast %40 : vector<1x1x128xf32> to vector<1x128xf32>
    %42 = arith.addf %39, %41 : vector<1x128xf32>
    %c0_33 = arith.constant 0 : index
    %c0_34 = arith.constant 0 : index
    %c0_35 = arith.constant 0 : index
    %43 = vector.load %arg4[%c0_33, %c0_34, %c0_35] : memref<5x32x128xf32, #tpu.memory_space<vmem>>, vector<1x32x128xf32>
    %44 = vector.shape_cast %43 : vector<1x32x128xf32> to vector<32x128xf32>
    %cst_36 = arith.constant dense<0.000000e+00> : vector<1x128xf32>
    %45 = tpu.matmul %7, %44, %cst_36 {dimension_numbers = #tpu.dot_dimension_numbers<[1], [0], [0], [1], [0, 0, 1, 1], [], []>} : vector<1x32xf32>, vector<32x128xf32>, vector<1x128xf32> -> vector<1x128xf32>
    %c0_37 = arith.constant 0 : index
    %c0_38 = arith.constant 0 : index
    %c0_39 = arith.constant 0 : index
    %46 = vector.load %arg5[%c0_37, %c0_38, %c0_39] : memref<5x1x128xf32, #tpu.memory_space<vmem>>, vector<1x1x128xf32>
    %47 = vector.shape_cast %46 : vector<1x1x128xf32> to vector<1x128xf32>
    %48 = arith.addf %45, %47 : vector<1x128xf32>
    %49 = vector.extract_strided_slice %48 {offsets = [0, 0], sizes = [1, 64], strides = [1, 1]} : vector<1x128xf32> to vector<1x64xf32>
    %50 = vector.extract_strided_slice %14 {offsets = [0, 0], sizes = [1, 64], strides = [1, 1]} : vector<1x128xf32> to vector<1x64xf32>
    %51 = arith.addf %49, %50 : vector<1x64xf32>
    %52 = arith.negf %51 : vector<1x64xf32>
    %53 = math.exp %52 : vector<1x64xf32>
    %cst_40 = arith.constant 1.000000e+00 : f32
    %54 = vector.broadcast %cst_40 : f32 to vector<1x64xf32>
    %55 = arith.addf %54, %53 : vector<1x64xf32>
    %56 = arith.divf %54, %55 : vector<1x64xf32>
    %57 = vector.extract_strided_slice %56 {offsets = [0, 0], sizes = [1, 32], strides = [1, 1]} : vector<1x64xf32> to vector<1x32xf32>
    %58 = vector.extract_strided_slice %56 {offsets = [0, 32], sizes = [1, 32], strides = [1, 1]} : vector<1x64xf32> to vector<1x32xf32>
    %59 = vector.extract_strided_slice %48 {offsets = [0, 64], sizes = [1, 32], strides = [1, 1]} : vector<1x128xf32> to vector<1x32xf32>
    %60 = vector.extract_strided_slice %14 {offsets = [0, 64], sizes = [1, 32], strides = [1, 1]} : vector<1x128xf32> to vector<1x32xf32>
    %61 = arith.mulf %57, %60 : vector<1x32xf32>
    %62 = arith.addf %59, %61 : vector<1x32xf32>
    %63 = math.tanh %62 : vector<1x32xf32>
    %cst_41 = arith.constant 1.000000e+00 : f32
    %64 = vector.broadcast %cst_41 : f32 to vector<1x32xf32>
    %65 = arith.subf %64, %58 : vector<1x32xf32>
    %66 = arith.mulf %65, %63 : vector<1x32xf32>
    %67 = vector.extract_strided_slice %3 {offsets = [0, 0], sizes = [1, 32], strides = [1, 1]} : vector<5x32xf32> to vector<1x32xf32>
    %68 = arith.mulf %58, %67 : vector<1x32xf32>
    %69 = arith.addf %66, %68 : vector<1x32xf32>
    %c0_42 = arith.constant 0 : index
    %c0_43 = arith.constant 0 : index
    %70 = vector.load %arg9[%c0_42, %c0_43] : memref<5x32xf32, #tpu.memory_space<vmem>>, vector<1x32xf32>
    tpu.vector_store %arg9[%c0_42, %c0_43], %69 {strides = array<i32>} : memref<5x32xf32, #tpu.memory_space<vmem>>, vector<1x32xf32>,
    %c1_44 = arith.constant 1 : index
    %c0_45 = arith.constant 0 : index
    %c0_46 = arith.constant 0 : index
    %71 = vector.load %arg4[%c1_44, %c0_45, %c0_46] : memref<5x32x128xf32, #tpu.memory_space<vmem>>, vector<1x32x128xf32>
    %72 = vector.shape_cast %71 : vector<1x32x128xf32> to vector<32x128xf32>
    %cst_47 = arith.constant dense<0.000000e+00> : vector<1x128xf32>
    %73 = tpu.matmul %69, %72, %cst_47 {dimension_numbers = #tpu.dot_dimension_numbers<[1], [0], [0], [1], [0, 0, 1, 1], [], []>} : vector<1x32xf32>, vector<32x128xf32>, vector<1x128xf32> -> vector<1x128xf32>
    %c1_48 = arith.constant 1 : index
    %c0_49 = arith.constant 0 : index
    %c0_50 = arith.constant 0 : index
    %74 = vector.load %arg5[%c1_48, %c0_49, %c0_50] : memref<5x1x128xf32, #tpu.memory_space<vmem>>, vector<1x1x128xf32>
    %75 = vector.shape_cast %74 : vector<1x1x128xf32> to vector<1x128xf32>
    %76 = arith.addf %73, %75 : vector<1x128xf32>
    %77 = vector.extract_strided_slice %76 {offsets = [0, 0], sizes = [1, 64], strides = [1, 1]} : vector<1x128xf32> to vector<1x64xf32>
    %78 = vector.extract_strided_slice %21 {offsets = [0, 0], sizes = [1, 64], strides = [1, 1]} : vector<1x128xf32> to vector<1x64xf32>
    %79 = arith.addf %77, %78 : vector<1x64xf32>
    %80 = arith.negf %79 : vector<1x64xf32>
    %81 = math.exp %80 : vector<1x64xf32>
    %cst_51 = arith.constant 1.000000e+00 : f32
    %82 = vector.broadcast %cst_51 : f32 to vector<1x64xf32>
    %83 = arith.addf %82, %81 : vector<1x64xf32>
    %84 = arith.divf %82, %83 : vector<1x64xf32>
    %85 = vector.extract_strided_slice %84 {offsets = [0, 0], sizes = [1, 32], strides = [1, 1]} : vector<1x64xf32> to vector<1x32xf32>
    %86 = vector.extract_strided_slice %84 {offsets = [0, 32], sizes = [1, 32], strides = [1, 1]} : vector<1x64xf32> to vector<1x32xf32>
    %87 = vector.extract_strided_slice %76 {offsets = [0, 64], sizes = [1, 32], strides = [1, 1]} : vector<1x128xf32> to vector<1x32xf32>
    %88 = vector.extract_strided_slice %21 {offsets = [0, 64], sizes = [1, 32], strides = [1, 1]} : vector<1x128xf32> to vector<1x32xf32>
    %89 = arith.mulf %85, %88 : vector<1x32xf32>
    %90 = arith.addf %87, %89 : vector<1x32xf32>
    %91 = math.tanh %90 : vector<1x32xf32>
    %cst_52 = arith.constant 1.000000e+00 : f32
    %92 = vector.broadcast %cst_52 : f32 to vector<1x32xf32>
    %93 = arith.subf %92, %86 : vector<1x32xf32>
    %94 = arith.mulf %93, %91 : vector<1x32xf32>
    %95 = vector.extract_strided_slice %3 {offsets = [1, 0], sizes = [1, 32], strides = [1, 1]} : vector<5x32xf32> to vector<1x32xf32>
    %96 = arith.mulf %86, %95 : vector<1x32xf32>
    %97 = arith.addf %94, %96 : vector<1x32xf32>
    %c1_53 = arith.constant 1 : index
    %c0_54 = arith.constant 0 : index
    %98 = vector.load %arg9[%c1_53, %c0_54] : memref<5x32xf32, #tpu.memory_space<vmem>>, vector<1x32xf32>
    tpu.vector_store %arg9[%c1_53, %c0_54], %97 {strides = array<i32>} : memref<5x32xf32, #tpu.memory_space<vmem>>, vector<1x32xf32>,
    %c2_55 = arith.constant 2 : index
    %c0_56 = arith.constant 0 : index
    %c0_57 = arith.constant 0 : index
    %99 = vector.load %arg4[%c2_55, %c0_56, %c0_57] : memref<5x32x128xf32, #tpu.memory_space<vmem>>, vector<1x32x128xf32>
    %100 = vector.shape_cast %99 : vector<1x32x128xf32> to vector<32x128xf32>
    %cst_58 = arith.constant dense<0.000000e+00> : vector<1x128xf32>
    %101 = tpu.matmul %97, %100, %cst_58 {dimension_numbers = #tpu.dot_dimension_numbers<[1], [0], [0], [1], [0, 0, 1, 1], [], []>} : vector<1x32xf32>, vector<32x128xf32>, vector<1x128xf32> -> vector<1x128xf32>
    %c2_59 = arith.constant 2 : index
    %c0_60 = arith.constant 0 : index
    %c0_61 = arith.constant 0 : index
    %102 = vector.load %arg5[%c2_59, %c0_60, %c0_61] : memref<5x1x128xf32, #tpu.memory_space<vmem>>, vector<1x1x128xf32>
    %103 = vector.shape_cast %102 : vector<1x1x128xf32> to vector<1x128xf32>
    %104 = arith.addf %101, %103 : vector<1x128xf32>
    %105 = vector.extract_strided_slice %104 {offsets = [0, 0], sizes = [1, 64], strides = [1, 1]} : vector<1x128xf32> to vector<1x64xf32>
    %106 = vector.extract_strided_slice %28 {offsets = [0, 0], sizes = [1, 64], strides = [1, 1]} : vector<1x128xf32> to vector<1x64xf32>
    %107 = arith.addf %105, %106 : vector<1x64xf32>
    %108 = arith.negf %107 : vector<1x64xf32>
    %109 = math.exp %108 : vector<1x64xf32>
    %cst_62 = arith.constant 1.000000e+00 : f32
    %110 = vector.broadcast %cst_62 : f32 to vector<1x64xf32>
    %111 = arith.addf %110, %109 : vector<1x64xf32>
    %112 = arith.divf %110, %111 : vector<1x64xf32>
    %113 = vector.extract_strided_slice %112 {offsets = [0, 0], sizes = [1, 32], strides = [1, 1]} : vector<1x64xf32> to vector<1x32xf32>
    %114 = vector.extract_strided_slice %112 {offsets = [0, 32], sizes = [1, 32], strides = [1, 1]} : vector<1x64xf32> to vector<1x32xf32>
    %115 = vector.extract_strided_slice %104 {offsets = [0, 64], sizes = [1, 32], strides = [1, 1]} : vector<1x128xf32> to vector<1x32xf32>
    %116 = vector.extract_strided_slice %28 {offsets = [0, 64], sizes = [1, 32], strides = [1, 1]} : vector<1x128xf32> to vector<1x32xf32>
    %117 = arith.mulf %113, %116 : vector<1x32xf32>
    %118 = arith.addf %115, %117 : vector<1x32xf32>
    %119 = math.tanh %118 : vector<1x32xf32>
    %cst_63 = arith.constant 1.000000e+00 : f32
    %120 = vector.broadcast %cst_63 : f32 to vector<1x32xf32>
    %121 = arith.subf %120, %114 : vector<1x32xf32>
    %122 = arith.mulf %121, %119 : vector<1x32xf32>
    %123 = vector.extract_strided_slice %3 {offsets = [2, 0], sizes = [1, 32], strides = [1, 1]} : vector<5x32xf32> to vector<1x32xf32>
    %124 = arith.mulf %114, %123 : vector<1x32xf32>
    %125 = arith.addf %122, %124 : vector<1x32xf32>
    %c2_64 = arith.constant 2 : index
    %c0_65 = arith.constant 0 : index
    %126 = vector.load %arg9[%c2_64, %c0_65] : memref<5x32xf32, #tpu.memory_space<vmem>>, vector<1x32xf32>
    tpu.vector_store %arg9[%c2_64, %c0_65], %125 {strides = array<i32>} : memref<5x32xf32, #tpu.memory_space<vmem>>, vector<1x32xf32>,
    %c3_66 = arith.constant 3 : index
    %c0_67 = arith.constant 0 : index
    %c0_68 = arith.constant 0 : index
    %127 = vector.load %arg4[%c3_66, %c0_67, %c0_68] : memref<5x32x128xf32, #tpu.memory_space<vmem>>, vector<1x32x128xf32>
    %128 = vector.shape_cast %127 : vector<1x32x128xf32> to vector<32x128xf32>
    %cst_69 = arith.constant dense<0.000000e+00> : vector<1x128xf32>
    %129 = tpu.matmul %125, %128, %cst_69 {dimension_numbers = #tpu.dot_dimension_numbers<[1], [0], [0], [1], [0, 0, 1, 1], [], []>} : vector<1x32xf32>, vector<32x128xf32>, vector<1x128xf32> -> vector<1x128xf32>
    %c3_70 = arith.constant 3 : index
    %c0_71 = arith.constant 0 : index
    %c0_72 = arith.constant 0 : index
    %130 = vector.load %arg5[%c3_70, %c0_71, %c0_72] : memref<5x1x128xf32, #tpu.memory_space<vmem>>, vector<1x1x128xf32>
    %131 = vector.shape_cast %130 : vector<1x1x128xf32> to vector<1x128xf32>
    %132 = arith.addf %129, %131 : vector<1x128xf32>
    %133 = vector.extract_strided_slice %132 {offsets = [0, 0], sizes = [1, 64], strides = [1, 1]} : vector<1x128xf32> to vector<1x64xf32>
    %134 = vector.extract_strided_slice %35 {offsets = [0, 0], sizes = [1, 64], strides = [1, 1]} : vector<1x128xf32> to vector<1x64xf32>
    %135 = arith.addf %133, %134 : vector<1x64xf32>
    %136 = arith.negf %135 : vector<1x64xf32>
    %137 = math.exp %136 : vector<1x64xf32>
    %cst_73 = arith.constant 1.000000e+00 : f32
    %138 = vector.broadcast %cst_73 : f32 to vector<1x64xf32>
    %139 = arith.addf %138, %137 : vector<1x64xf32>
    %140 = arith.divf %138, %139 : vector<1x64xf32>
    %141 = vector.extract_strided_slice %140 {offsets = [0, 0], sizes = [1, 32], strides = [1, 1]} : vector<1x64xf32> to vector<1x32xf32>
    %142 = vector.extract_strided_slice %140 {offsets = [0, 32], sizes = [1, 32], strides = [1, 1]} : vector<1x64xf32> to vector<1x32xf32>
    %143 = vector.extract_strided_slice %132 {offsets = [0, 64], sizes = [1, 32], strides = [1, 1]} : vector<1x128xf32> to vector<1x32xf32>
    %144 = vector.extract_strided_slice %35 {offsets = [0, 64], sizes = [1, 32], strides = [1, 1]} : vector<1x128xf32> to vector<1x32xf32>
    %145 = arith.mulf %141, %144 : vector<1x32xf32>
    %146 = arith.addf %143, %145 : vector<1x32xf32>
    %147 = math.tanh %146 : vector<1x32xf32>
    %cst_74 = arith.constant 1.000000e+00 : f32
    %148 = vector.broadcast %cst_74 : f32 to vector<1x32xf32>
    %149 = arith.subf %148, %142 : vector<1x32xf32>
    %150 = arith.mulf %149, %147 : vector<1x32xf32>
    %151 = vector.extract_strided_slice %3 {offsets = [3, 0], sizes = [1, 32], strides = [1, 1]} : vector<5x32xf32> to vector<1x32xf32>
    %152 = arith.mulf %142, %151 : vector<1x32xf32>
    %153 = arith.addf %150, %152 : vector<1x32xf32>
    %c3_75 = arith.constant 3 : index
    %c0_76 = arith.constant 0 : index
    %154 = vector.load %arg9[%c3_75, %c0_76] : memref<5x32xf32, #tpu.memory_space<vmem>>, vector<1x32xf32>
    tpu.vector_store %arg9[%c3_75, %c0_76], %153 {strides = array<i32>} : memref<5x32xf32, #tpu.memory_space<vmem>>, vector<1x32xf32>,
    %c4_77 = arith.constant 4 : index
    %c0_78 = arith.constant 0 : index
    %c0_79 = arith.constant 0 : index
    %155 = vector.load %arg4[%c4_77, %c0_78, %c0_79] : memref<5x32x128xf32, #tpu.memory_space<vmem>>, vector<1x32x128xf32>
    %156 = vector.shape_cast %155 : vector<1x32x128xf32> to vector<32x128xf32>
    %cst_80 = arith.constant dense<0.000000e+00> : vector<1x128xf32>
    %157 = tpu.matmul %153, %156, %cst_80 {dimension_numbers = #tpu.dot_dimension_numbers<[1], [0], [0], [1], [0, 0, 1, 1], [], []>} : vector<1x32xf32>, vector<32x128xf32>, vector<1x128xf32> -> vector<1x128xf32>
    %c4_81 = arith.constant 4 : index
    %c0_82 = arith.constant 0 : index
    %c0_83 = arith.constant 0 : index
    %158 = vector.load %arg5[%c4_81, %c0_82, %c0_83] : memref<5x1x128xf32, #tpu.memory_space<vmem>>, vector<1x1x128xf32>
    %159 = vector.shape_cast %158 : vector<1x1x128xf32> to vector<1x128xf32>
    %160 = arith.addf %157, %159 : vector<1x128xf32>
    %161 = vector.extract_strided_slice %160 {offsets = [0, 0], sizes = [1, 64], strides = [1, 1]} : vector<1x128xf32> to vector<1x64xf32>
    %162 = vector.extract_strided_slice %42 {offsets = [0, 0], sizes = [1, 64], strides = [1, 1]} : vector<1x128xf32> to vector<1x64xf32>
    %163 = arith.addf %161, %162 : vector<1x64xf32>
    %164 = arith.negf %163 : vector<1x64xf32>
    %165 = math.exp %164 : vector<1x64xf32>
    %cst_84 = arith.constant 1.000000e+00 : f32
    %166 = vector.broadcast %cst_84 : f32 to vector<1x64xf32>
    %167 = arith.addf %166, %165 : vector<1x64xf32>
    %168 = arith.divf %166, %167 : vector<1x64xf32>
    %169 = vector.extract_strided_slice %168 {offsets = [0, 0], sizes = [1, 32], strides = [1, 1]} : vector<1x64xf32> to vector<1x32xf32>
    %170 = vector.extract_strided_slice %168 {offsets = [0, 32], sizes = [1, 32], strides = [1, 1]} : vector<1x64xf32> to vector<1x32xf32>
    %171 = vector.extract_strided_slice %160 {offsets = [0, 64], sizes = [1, 32], strides = [1, 1]} : vector<1x128xf32> to vector<1x32xf32>
    %172 = vector.extract_strided_slice %42 {offsets = [0, 64], sizes = [1, 32], strides = [1, 1]} : vector<1x128xf32> to vector<1x32xf32>
    %173 = arith.mulf %169, %172 : vector<1x32xf32>
    %174 = arith.addf %171, %173 : vector<1x32xf32>
    %175 = math.tanh %174 : vector<1x32xf32>
    %cst_85 = arith.constant 1.000000e+00 : f32
    %176 = vector.broadcast %cst_85 : f32 to vector<1x32xf32>
    %177 = arith.subf %176, %170 : vector<1x32xf32>
    %178 = arith.mulf %177, %175 : vector<1x32xf32>
    %179 = vector.extract_strided_slice %3 {offsets = [4, 0], sizes = [1, 32], strides = [1, 1]} : vector<5x32xf32> to vector<1x32xf32>
    %180 = arith.mulf %170, %179 : vector<1x32xf32>
    %181 = arith.addf %178, %180 : vector<1x32xf32>
    %c4_86 = arith.constant 4 : index
    %c0_87 = arith.constant 0 : index
    %182 = vector.load %arg9[%c4_86, %c0_87] : memref<5x32xf32, #tpu.memory_space<vmem>>, vector<1x32xf32>
    tpu.vector_store %arg9[%c4_86, %c0_87], %181 {strides = array<i32>} : memref<5x32xf32, #tpu.memory_space<vmem>>, vector<1x32xf32>,
    %183 = arith.index_cast %arg0 : i32 to index
    %c0_88 = arith.constant 0 : index
    %184 = vector.load %arg8[%183, %c0_88] : memref<1x32xf32, #tpu.memory_space<vmem>>, vector<1x32xf32>
    tpu.vector_store %arg8[%183, %c0_88], %181 {strides = array<i32>} : memref<1x32xf32, #tpu.memory_space<vmem>>, vector<1x32xf32>,
    return
  }
  func.func @transform_0(%arg0: i32, %arg1: memref<1xi32, #tpu.memory_space<smem>>) -> (i32, i32) {
    %c0_i32 = arith.constant 0 : i32
    %c0_i32_0 = arith.constant 0 : i32
    %c0_i32_1 = arith.constant 0 : i32
    return %c0_i32, %c0_i32_0 : i32, i32
  }
  func.func @transform_1(%arg0: i32, %arg1: memref<1xi32, #tpu.memory_space<smem>>) -> (i32, i32) {
    %c0_i32 = arith.constant 0 : i32
    %c0_i32_0 = arith.constant 0 : i32
    %c0_i32_1 = arith.constant 0 : i32
    return %c0_i32, %c0_i32_0 : i32, i32
  }
  func.func @transform_2(%arg0: i32, %arg1: memref<1xi32, #tpu.memory_space<smem>>) -> (i32, i32, i32) {
    %c0_i32 = arith.constant 0 : i32
    %c0_i32_0 = arith.constant 0 : i32
    %c0_i32_1 = arith.constant 0 : i32
    %c0_i32_2 = arith.constant 0 : i32
    return %c0_i32, %c0_i32_0, %c0_i32_1 : i32, i32, i32
  }
  func.func @transform_3(%arg0: i32, %arg1: memref<1xi32, #tpu.memory_space<smem>>) -> (i32, i32, i32) {
    %c0_i32 = arith.constant 0 : i32
    %c0_i32_0 = arith.constant 0 : i32
    %c0_i32_1 = arith.constant 0 : i32
    %c0_i32_2 = arith.constant 0 : i32
    return %c0_i32, %c0_i32_0, %c0_i32_1 : i32, i32, i32
  }
  func.func @transform_4(%arg0: i32, %arg1: memref<1xi32, #tpu.memory_space<smem>>) -> (i32, i32, i32) {
    %c0_i32 = arith.constant 0 : i32
    %c0_i32_0 = arith.constant 0 : i32
    %c0_i32_1 = arith.constant 0 : i32
    %c0_i32_2 = arith.constant 0 : i32
    return %c0_i32, %c0_i32_0, %c0_i32_1 : i32, i32, i32
  }
  func.func @transform_5(%arg0: i32, %arg1: memref<1xi32, #tpu.memory_space<smem>>) -> (i32, i32, i32) {
    %c0_i32 = arith.constant 0 : i32
    %c0_i32_0 = arith.constant 0 : i32
    %c0_i32_1 = arith.constant 0 : i32
    %c0_i32_2 = arith.constant 0 : i32
    return %c0_i32, %c0_i32_0, %c0_i32_1 : i32, i32, i32
  }
  func.func @transform_6(%arg0: i32, %arg1: memref<1xi32, #tpu.memory_space<smem>>) -> (i32, i32) {
    %c0_i32 = arith.constant 0 : i32
    %c0_i32_0 = arith.constant 0 : i32
    %c0_i32_1 = arith.constant 0 : i32
    return %c0_i32, %c0_i32_0 : i32, i32
  }
  func.func @transform_7(%arg0: i32, %arg1: memref<1xi32, #tpu.memory_space<smem>>) -> (i32, i32) {
    %c0_i32 = arith.constant 0 : i32
    %c0_i32_0 = arith.constant 0 : i32
    %c0_i32_1 = arith.constant 0 : i32
    return %c0_i32, %c0_i32_0 : i32, i32
  }
}

</mosaic_0001>

<bundles_post_ra>
// kernel: tpu_custom_call.1
= control target key start
LH: loop header
LB: loop body
LE: loop exit
PB: predicated region body
PF: predicated region fallthrough
CT: control target
= control target key end

     0   :  { %15 = vsyncpa [#allocation5], 0  ;;  %s1656_s0 = inlined_call_operand.<no memory space> [shape: s32[1], index: 0, kind: input, shape index: {}]   ;;  %s1657_s1 = inlined_call_operand.hbm [shape: f32[16,32], index: 1, kind: input, shape index: {}]   ;;  %s1658_s2 = inlined_call_operand.vmem [shape: f32[1,32], index: 2, kind: input, shape index: {}]   ;;  %s1659_s3 = inlined_call_operand.hbm [shape: f32[5,32,128], index: 3, kind: input, shape index: {}]   ;;  %s1660_s4 = inlined_call_operand.vmem [shape: f32[5,1,128], index: 4, kind: input, shape index: {}]   ;;  %s1661_s5 = inlined_call_operand.hbm [shape: f32[5,32,128], index: 5, kind: input, shape index: {}]   ;;  %s1662_s6 = inlined_call_operand.vmem [shape: f32[5,1,128], index: 6, kind: input, shape index: {}]   ;;  %s1663_s7 = inlined_call_operand.hbm [shape: f32[1,32], index: 7, kind: output, shape index: {0}]   ;;  %s1664_s8 = inlined_call_operand.hbm [shape: f32[5,32], index: 8, kind: output, shape index: {1}]  }
   0x1   :  { %16 = vsyncpa [#allocation8], 0 }
   0x2   :  { %17 = vsyncpa [#allocation6], 0 }
   0x3   :  { %18 = vsyncpa [#allocation12], 0  ;;  %s1417_s27 = smov [#allocation7]   ;;  %s1418_s29 = smov [#allocation4]  }
   0x4   :  { %s38_s28 = sshll.u32 %s1417_s27, 4  ;;  %s24_s30 = sshll.u32 %s1418_s29, 4  ;;  %s39_s28 = int_to_ptr.vmem [resolvable:$true] %s38_s28  ;;  %s25_s30 = int_to_ptr.vmem [resolvable:$true] %s24_s30 }
   0x5   :  { %s1317_s9 = scalar_lea.vmem %s39_s28, 2560  ;;  %p1322_p1 = scmp.lt.s32.totalorder %s39_s28, %s39_s28 }
   0x6   :  { %p1318_p0 = scmp.ne.s32.totalorder %s39_s28, %s1317_s9  ;;  %p1323_p2 = scmp.lt.s32.totalorder %s1317_s9, %s1317_s9 }
   0x8   :  { %p1324_p3 = por %p1323_p2, %p1322_p1 }
   0xa   :  { %p1325_p4 = pnand %p1324_p3, %p1318_p0 }
   0xc   :  { %1328 = shalt.err (!%p1325_p4)
}
   0xd   :  { %s1419_s10 = smov 128   ;;  %s1420_s11 = smov 8  }
   0xe   :  { %44 = dma.hbm_to_vmem [thread:$0]  %s1659_s3, 2560, %s39_s28, [#allocation8], %s1419_s10, %s1419_s10, %s1420_s11  }
   0xf   :  { %s1337_s14 = scalar_lea.vmem %s25_s30, 256  ;;  %p1342_p6 = scmp.lt.s32.totalorder %s25_s30, %s25_s30 }
  0x10   :  { %p1338_p5 = scmp.ne.s32.totalorder %s25_s30, %s1337_s14  ;;  %p1343_p7 = scmp.lt.s32.totalorder %s1337_s14, %s1337_s14 }
  0x12   :  { %p1344_p8 = por %p1343_p7, %p1342_p6 }
  0x14   :  { %p1345_p9 = pnand %p1344_p8, %p1338_p5 }
  0x16   :  { %1348 = shalt.err (!%p1345_p9)
}
  0x17   :  { %30 = dma.hbm_to_vmem [thread:$0]  %s1657_s1, 256, %s25_s30, [#allocation5], %s1419_s10, %s1419_s10, %s1420_s11  }
  0x18   :  { %s1421_s17 = smov [#allocation9]  }
  0x19   :  { %s52_s18 = sshll.u32 %s1421_s17, 4  ;;  %s53_s18 = int_to_ptr.vmem [resolvable:$true] %s52_s18 }
  0x1a   :  { %s1357_s19 = scalar_lea.vmem %s53_s18, 2560  ;;  %p1362_p11 = scmp.lt.s32.totalorder %s53_s18, %s53_s18 }
  0x1b   :  { %p1358_p10 = scmp.ne.s32.totalorder %s53_s18, %s1357_s19  ;;  %p1363_p12 = scmp.lt.s32.totalorder %s1357_s19, %s1357_s19 }
  0x1d   :  { %p1364_p13 = por %p1363_p12, %p1362_p11 }
  0x1f   :  { %p1365_p0 = pnand %p1364_p13, %p1358_p10 }
  0x21   :  { %1368 = shalt.err (!%p1365_p0)
}
  0x22   :  { %58 = dma.hbm_to_vmem [thread:$0]  %s1661_s5, 2560, %s53_s18, [#allocation8], %s1419_s10, %s1419_s10, %s1420_s11  }
  0x23   :  { %1409 = dma.done.wait [#allocation5], 256  }
  0x24   :  { %1410 = vsyncadd [#allocation5], 4294967040 }
  0x25   :  { %1411 = dma.done.wait [#allocation8], 5120  }
  0x26   :  { %1412 = vsyncadd [#allocation8], 4294962176  ;;  %v1422_v0 = vmov 0.0   ;;  %vm1423_vm0 = vmmov 0   ;;  %v90_v1 = vld [vmem:[#allocation9 + $0x18] sm:$0xff]  ;;  %v89_v3 = vld [vmem:[#allocation9 + $0x10] sm:$0xff] }
  0x27   :  { %1157 = vmatprep.subr.mxu0 %v1422_v0  ;;  %1168 = vmatprep.subr.mxu1 %v1422_v0  ;;  %v170_v2 = vld [vmem:[#allocation9 + $0x38] sm:$0xff]  ;;  %vm81_vm1 = vcmask 258048   ;;  %v169_v4 = vld [vmem:[#allocation9 + $0x30] sm:$0xff]  ;;  %v88_v5 = vld [vmem:[#allocation9 + $0x8] sm:$0xff]  ;;  %vm92_vm2 = vcmask 261120   ;;  %s85_s22 = scalar_lea.vmem [#allocation4], %s1656_s0 }
  0x28   :  { %1165 = vmatprep.mubr.msk.f32.mxu0 %vm1423_vm0, %v1422_v0  ;;  %1176 = vmatprep.mubr.msk.f32.mxu1 %vm1423_vm0, %v1422_v0  ;;  %v168_v6 = vld [vmem:[#allocation9 + $0x28] sm:$0xff]  ;;  %v1083_v7 = vld [vmem:[%s1658_s2] ss:$0 sm:$0xff]  ;;  %v87_v8 = vld [vmem:[#allocation9] sm:$0xff]  ;;  %s1424_s0 = smov 64   ;;  %s1425_s27 = smov 96  }
  0x29   :  { %1158 = vmatpush3.msra.mxu0 %v90_v1  ;;  %1169 = vmatpush3.msra.mxu1 %v170_v2  ;;  %82 = vst.msk [vmem:[#allocation11] sm:$0x1f] %vm81_vm1, %v1083_v7  ;;  %v167_v9 = vld [vmem:[#allocation9 + $0x20] sm:$0xff]  ;;  %v330_v12 = vld [vmem:[#allocation9 + $0x78] sm:$0xff]  ;;  %v329_v13 = vld [vmem:[#allocation9 + $0x70] sm:$0xff]  ;;  %s1426_s30 = smov 32  }
  0x2a   :  { %1159 = vmatprep.subr.mxu0 %v1422_v0  ;;  %1170 = vmatprep.subr.mxu1 %v1422_v0  ;;  %v328_v14 = vld [vmem:[#allocation9 + $0x68] sm:$0xff]  ;;  %v327_v15 = vld [vmem:[#allocation9 + $0x60] sm:$0xff]  ;;  %v489_v17 = vld [vmem:[#allocation7 + $0x18] sm:$0xff]  ;;  %vm597_vm3 = vcmask 253952   ;;  %s1428_s5 = smov [#allocation11]  }
  0x2b   :  { %1160 = vmatpush3.msra.mxu0 %v89_v3  ;;  %1171 = vmatpush3.msra.mxu1 %v169_v4  ;;  %v488_v18 = vld [vmem:[#allocation7 + $0x10] sm:$0xff]  ;;  %v487_v19 = vld [vmem:[#allocation7 + $0x8] sm:$0xff]  ;;  %v486_v20 = vld [vmem:[#allocation7] sm:$0xff]  ;;  %s1068_s2 = sshll.u32 %s1428_s5, 4  ;;  %s1069_s2 = int_to_ptr.vmem [resolvable:$true] %s1068_s2 }
  0x2c   :  { %1161 = vmatprep.subr.mxu0 %v1422_v0  ;;  %1172 = vmatprep.subr.mxu1 %v1422_v0  ;;  %v86_v21 = vld [vmem:[%s85_s22] sm:$0x1]  ;;  %v250_v43 = vld [vmem:[#allocation9 + $0x58] sm:$0xff]  ;;  %v248_v45 = vld [vmem:[#allocation9 + $0x48] sm:$0xff] }
  0x2d   :  { %1162 = vmatpush3.msra.mxu0 %v88_v5  ;;  %1173 = vmatpush3.msra.mxu1 %v168_v6  ;;  %v91_v22 = vld [vmem:[%s1662_s6] sm:$0x1]  ;;  %v247_v47 = vld [vmem:[#allocation9 + $0x40] sm:$0xff]  ;;  %v410_v49 = vld [vmem:[#allocation9 + $0x98] sm:$0xff] }
  0x2e   :  { %1163 = vmatprep.subr.mxu0 %v1422_v0  ;;  %1174 = vmatprep.subr.mxu1 %v1422_v0  ;;  %v490_v32 = vld [vmem:[%s1660_s4] sm:$0x1]  ;;  %v1085_v50 = vld [vmem:[%s1662_s6 + $0x1] sm:$0x1]  ;;  %v408_v52 = vld [vmem:[#allocation9 + $0x88] sm:$0xff] }
  0x2f   :  { %1164 = vmatpush3.msra.mxu0 %v87_v8  ;;  %1175 = vmatpush3.msra.mxu1 %v167_v9  ;;  %v249_v44 = vld [vmem:[#allocation9 + $0x50] sm:$0xff]  ;;  %v407_v54 = vld [vmem:[#allocation9 + $0x80] sm:$0xff]  ;;  %v603_v56 = vld [vmem:[#allocation7 + $0x38] sm:$0xff] }
  0x30   :  { %1190 = vmatprep.subr.mxu1 %v1422_v0  ;;  %1179 = vmatprep.subr.mxu0 %v1422_v0  ;;  %v1500_v10 = vld [vmem:[#allocation11] sm:$0x1f]  ;;  %v409_v51 = vld [vmem:[#allocation9 + $0x90] sm:$0xff]  ;;  %v601_v58 = vld [vmem:[#allocation7 + $0x28] sm:$0xff] }
  0x31   :  { %1166 = vmatmul.mubr.msk.f32.vlgmr.msra.gmra.mxu0 %vm92_vm2, %v1500_v10  ;;  %v173_v11 = vrot.slane %v1500_v10, 1  ;;  %v333_v16 = vrot.slane %v1500_v10, 3  ;;  %v253_v48 = vrot.slane %v1500_v10, 2  ;;  %v413_v55 = vrot.slane %v1500_v10, 4  ;;  %v602_v57 = vld [vmem:[#allocation7 + $0x30] sm:$0xff]  ;;  %v600_v59 = vld [vmem:[#allocation7 + $0x20] sm:$0xff] }
  0x32   :  { %1187 = vmatprep.mubr.msk.f32.mxu0 %vm1423_vm0, %v1422_v0  ;;  %1180 = vmatpush3.msra.mxu0 %v250_v43  ;;  %v1095_v8 = vld [vmem:[%s1660_s4 + $0x1] sm:$0x1] }
  0x33   :  { %1177 = vmatmul.mubr.msk.f32.vlgmr.msra.gmra.mxu1 %vm92_vm2, %v173_v11  ;;  %1181 = vmatprep.subr.mxu0 %v1422_v0 }
  0x34   :  { %1191 = vmatpush3.msra.mxu1 %v330_v12  ;;  %1198 = vmatprep.mubr.msk.f32.mxu1 %vm1423_vm0, %v1422_v0 }
  0x35   :  { %1192 = vmatprep.subr.mxu1 %v1422_v0  ;;  %1182 = vmatpush3.msra.mxu0 %v249_v44 }
  0x36   :  { %1193 = vmatpush3.msra.mxu1 %v329_v13  ;;  %1183 = vmatprep.subr.mxu0 %v1422_v0 }
  0x37   :  { %1194 = vmatprep.subr.mxu1 %v1422_v0  ;;  %1184 = vmatpush3.msra.mxu0 %v248_v45 }
  0x38   :  { %1195 = vmatpush3.msra.mxu1 %v328_v14  ;;  %1185 = vmatprep.subr.mxu0 %v1422_v0 }
  0x39   :  { %1196 = vmatprep.subr.mxu1 %v1422_v0  ;;  %1186 = vmatpush3.msra.mxu0 %v247_v47 }
  0x3a   :  { %1197 = vmatpush3.msra.mxu1 %v327_v15  ;;  %1188 = vmatmul.mubr.msk.f32.vlgmr.msra.gmra.mxu0 %vm92_vm2, %v253_v48 }
  0x3b   :  { %1212 = vmatprep.subr.mxu1 %v1422_v0  ;;  %1199 = vmatmul.mubr.msk.f32.vlgmr.msra.gmra.mxu1 %vm92_vm2, %v333_v16 }
  0x3c   :  { %1213 = vmatpush3.msra.mxu1 %v489_v17  ;;  %1220 = vmatprep.mubr.msk.f32.mxu1 %vm1423_vm0, %v1422_v0 }
  0x3d   :  { %1214 = vmatprep.subr.mxu1 %v1422_v0  ;;  %1201 = vmatprep.subr.mxu0 %v1422_v0 }
  0x3e   :  { %1215 = vmatpush3.msra.mxu1 %v488_v18  ;;  %1202 = vmatpush3.msra.mxu0 %v410_v49 }
  0x3f   :  { %1216 = vmatprep.subr.mxu1 %v1422_v0  ;;  %1203 = vmatprep.subr.mxu0 %v1422_v0 }
  0x40   :  { %1217 = vmatpush3.msra.mxu1 %v487_v19  ;;  %1209 = vmatprep.mubr.msk.f32.mxu0 %vm1423_vm0, %v1422_v0 }
  0x41   :  { %1218 = vmatprep.subr.mxu1 %v1422_v0  ;;  %1204 = vmatpush3.msra.mxu0 %v409_v51 }
  0x42   :  { %1219 = vmatpush3.msra.mxu1 %v486_v20  ;;  %1205 = vmatprep.subr.mxu0 %v1422_v0 }
  0x43   :  { %1221 = vmatmul.mubr.msk.f32.vlgmr.msra.gmra.mxu1 %vm92_vm2, %v86_v21  ;;  %1234 = vmatprep.subr.mxu1 %v1422_v0 }
  0x44   :  { %1242 = vmatprep.mubr.msk.f32.mxu1 %vm1423_vm0, %v1422_v0  ;;  %1206 = vmatpush3.msra.mxu0 %v408_v52 }
  0x45   :  { %1207 = vmatprep.subr.mxu0 %v1422_v0 }
  0x46   :  { %1208 = vmatpush3.msra.mxu0 %v407_v54  ;;  %v829_v54 = vld [vmem:[#allocation7 + $0x78] sm:$0xff] }
  0x47   :  { %1210 = vmatmul.mubr.msk.f32.vlgmr.msra.gmra.mxu0 %vm92_vm2, %v413_v55  ;;  %1223 = vmatprep.subr.mxu0 %v1422_v0 }
  0x48   :  { %1224 = vmatpush3.msra.mxu0 %v603_v56  ;;  %1231 = vmatprep.mubr.msk.f32.mxu0 %vm1423_vm0, %v1422_v0  ;;  %v828_v56 = vld [vmem:[#allocation7 + $0x70] sm:$0xff] }
  0x49   :  { %1225 = vmatprep.subr.mxu0 %v1422_v0 }
  0x4a   :  { %1226 = vmatpush3.msra.mxu0 %v602_v57  ;;  %v827_v57 = vld [vmem:[#allocation7 + $0x68] sm:$0xff] }
  0x4b   :  { %1227 = vmatprep.subr.mxu0 %v1422_v0 }
  0x4c   :  { %1228 = vmatpush3.msra.mxu0 %v601_v58  ;;  %v826_v58 = vld [vmem:[#allocation7 + $0x60] sm:$0xff] }
  0x4d   :  { %1229 = vmatprep.subr.mxu0 %v1422_v0 }
  0x4e   :  { %1230 = vmatpush3.msra.mxu0 %v600_v59 }
  0x4f   :  { %1245 = vmatprep.subr.mxu0 %v1422_v0 }
  0xf1   :  { %v162_v23 = vpop.f32.mrf.mxu0 }
  0xf2   :  { %v163_v24 = vadd.f32 %v162_v23, %v91_v22  ;;  %v1087_v22 = vld [vmem:[%s1662_s6 + $0x2] sm:$0x1] }
  0xf3   :  { %v1167_v25 = vpop.f32.mrf.mxu0  ;;  %v242_v26 = vpop.f32.mrf.mxu1 }
  0xf4   :  { %572 = vrot.lane.b32.xlu0 %v163_v24, %s1424_s0  ;;  %v243_v53 = vadd.f32 %v1085_v50, %v242_v26  ;;  %v716_v26 = vld [vmem:[#allocation7 + $0x58] sm:$0xff]  ;;  %v1089_v50 = vld [vmem:[%s1662_s6 + $0x3] sm:$0x1] }
  0xf5   :  { %v1178_v27 = vpop.f32.mrf.mxu1  ;;  %1235 = vmatpush3.msra.mxu1 %v716_v26 }
  0xf6   :  { %v715_v27 = vld [vmem:[#allocation7 + $0x50] sm:$0xff]  ;;  %1236 = vmatprep.subr.mxu1 %v1422_v0 }
  0xf7   :  { %1237 = vmatpush3.msra.mxu1 %v715_v27 }
  0xf8   :  { %1238 = vmatprep.subr.mxu1 %v1422_v0 }
  0xfa   :  { %v322_v3 = vpop.f32.mrf.mxu0 }
  0xfb   :  { %v1536_v28 = vpop.f32.mrf.mxu1  ;;  %v323_v23 = vadd.f32 %v1087_v22, %v322_v3  ;;  %v941_v22 = vld [vmem:[#allocation7 + $0x90] sm:$0xff] }
  0xfc   :  { %v1189_v4 = vpop.f32.mrf.mxu0  ;;  %v403_v51 = vadd.f32 %v1089_v50, %v1536_v28 }
  0xfd   :  { %v1200_v29 = vpop.f32.mrf.mxu1 }
  0xfe   :  { %v714_v29 = vld [vmem:[#allocation7 + $0x48] sm:$0xff] }
  0xff   :  { %1239 = vmatpush3.msra.mxu1 %v714_v29 }
 0x100   :  { %1240 = vmatprep.subr.mxu1 %v1422_v0 }
 0x103   :  { %v560_v30 = vpop.f32.mrf.mxu1 }
 0x104   :  { %v561_v33 = vadd.f32 %v560_v30, %v490_v32  ;;  %v713_v30 = vld [vmem:[#allocation7 + $0x40] sm:$0xff] }
 0x105   :  { %v1222_v31 = vpop.f32.mrf.mxu1  ;;  %1241 = vmatpush3.msra.mxu1 %v713_v30 }
 0x106   :  { %v564_v34 = vadd.f32 %v561_v33, %v163_v24  ;;  %1256 = vmatprep.subr.mxu1 %v1422_v0 }
 0x107   :  { %v1574_v5 = vpop.f32.mrf.mxu0 }
 0x108   :  { %v1094_v35 = vmul.f32 -1.442695, %v564_v34 }
 0x109   :  { %v1211_v6 = vpop.f32.mrf.mxu0 }
 0x10a   :  { %1279 = vpow2.f32 %v1094_v35 }
 0x117   :  { %v1280_v36 = vpop.eup %1279 }
 0x118   :  { %v568_v37 = vadd.f32 1.0, %v1280_v36 }
 0x11a   :  { %1281 = vrcp.f32 %v568_v37 }
 0x127   :  { %v1282_v38 = vpop.eup %1281 }
 0x128   :  { %v582_v61 = vsub.f32 1.0, %v1282_v38 }
 0x166   :  { %v573_v39 = vpop.permute.xlu0 %572 }
 0x167   :  { %v575_v40 = vmul.f32 %v1282_v38, %v573_v39 }
 0x169   :  { %577 = vrot.lane.b32.xlu0 %v575_v40, %s1424_s0 }
 0x1db   :  { %v578_v41 = vpop.permute.xlu0 %577 }
 0x1dc   :  { %v580_v42 = vadd.f32 %v578_v41, %v561_v33 }
 0x1de   :  { %1283 = vtanh.f32 %v580_v42 }
 0x1eb   :  { %v1284_v46 = vpop.eup %1283 }
 0x1ec   :  { %584 = vrot.lane.b32.xlu1 %v1284_v46, %s1425_s27 }
 0x1f0   :  { %588 = vrot.lane.b32.xlu1 %v1500_v10, %s1426_s30 }
 0x1f4   :  { %686 = vrot.lane.b32.xlu1 %v243_v53, %s1424_s0 }
 0x25e   :  { %v585_v60 = vpop.permute.xlu1 %584 }
 0x25f   :  { %v587_v63 = vmul.f32 %v585_v60, %v582_v61 }
 0x262   :  { %v589_v62 = vpop.permute.xlu1 %588 }
 0x263   :  { %v591_v1 = vmul.f32 %v1282_v38, %v589_v62  ;;  %v1098_v38 = vld [vmem:[%s1660_s4 + $0x2] sm:$0x1] }
 0x265   :  { %v592_v2 = vadd.f32 %v591_v1, %v587_v63 }
 0x266   :  { %v687_v20 = vpop.permute.xlu1 %686 }
 0x267   :  { %594 = vrot.lane.b32.xlu0 %v592_v2, %s1425_s27  ;;  %v1101_v2 = vld [vmem:[%s1660_s4 + $0x3] sm:$0x1] }
 0x2d9   :  { %v595_v7 = vpop.permute.xlu0 %594 }
 0x2da   :  { %598 = vst.msk [vmem:[#allocation11] sm:$0x1] %vm597_vm3, %v595_v7  ;;  %1232 = vmatmul.mubr.msk.f32.vlgmr.msra.gmra.mxu0 %vm92_vm2, %v595_v7 }
 0x2db   :  { %1253 = vmatprep.mubr.msk.f32.mxu0 %vm1423_vm0, %v1422_v0  ;;  %1246 = vmatpush3.msra.mxu0 %v829_v54 }
 0x2dc   :  { %1247 = vmatprep.subr.mxu0 %v1422_v0 }
 0x2dd   :  { %1248 = vmatpush3.msra.mxu0 %v828_v56 }
 0x2de   :  { %1249 = vmatprep.subr.mxu0 %v1422_v0 }
 0x2df   :  { %1250 = vmatpush3.msra.mxu0 %v827_v57 }
 0x2e0   :  { %1251 = vmatprep.subr.mxu0 %v1422_v0 }
 0x2e1   :  { %1252 = vmatpush3.msra.mxu0 %v826_v58 }
 0x39a   :  { %v674_v9 = vpop.f32.mrf.mxu0 }
 0x39b   :  { %v675_v12 = vadd.f32 %v1095_v8, %v674_v9 }
 0x39c   :  { %v1233_v13 = vpop.f32.mrf.mxu0 }
 0x39d   :  { %v678_v14 = vadd.f32 %v675_v12, %v243_v53 }
 0x39f   :  { %v1097_v15 = vmul.f32 -1.442695, %v678_v14 }
 0x3a1   :  { %1285 = vpow2.f32 %v1097_v15 }
 0x3ae   :  { %v1286_v17 = vpop.eup %1285 }
 0x3af   :  { %v682_v18 = vadd.f32 1.0, %v1286_v17  ;;  %v1091_v17 = vld [vmem:[%s1662_s6 + $0x4] sm:$0x1] }
 0x3b1   :  { %1287 = vrcp.f32 %v682_v18  ;;  %v483_v18 = vadd.f32 %v1091_v17, %v1574_v5 }
 0x3be   :  { %v1288_v19 = vpop.eup %1287 }
 0x3bf   :  { %v689_v21 = vmul.f32 %v1288_v19, %v687_v20  ;;  %v696_v32 = vsub.f32 1.0, %v1288_v19 }
 0x3c1   :  { %691 = vrot.lane.b32.xlu0 %v689_v21, %s1424_s0  ;;  %v942_v21 = vld [vmem:[#allocation7 + $0x98] sm:$0xff] }
 0x3c5   :  { %702 = vrot.lane.b32.xlu0 %v173_v11, %s1426_s30 }
 0x3c9   :  { %799 = vrot.lane.b32.xlu0 %v323_v23, %s1424_s0 }
 0x433   :  { %v692_v24 = vpop.permute.xlu0 %691 }
 0x434   :  { %v694_v25 = vadd.f32 %v692_v24, %v675_v12  ;;  %v939_v24 = vld [vmem:[#allocation7 + $0x80] sm:$0xff] }
 0x436   :  { %1289 = vtanh.f32 %v694_v25 }
 0x437   :  { %v703_v31 = vpop.permute.xlu0 %702 }
 0x438   :  { %v705_v34 = vmul.f32 %v1288_v19, %v703_v31 }
 0x43b   :  { %v800_v47 = vpop.permute.xlu0 %799 }
 0x443   :  { %v1290_v11 = vpop.eup %1289 }
 0x444   :  { %698 = vrot.lane.b32.xlu1 %v1290_v11, %s1425_s27 }
 0x4b6   :  { %v699_v33 = vpop.permute.xlu1 %698 }
 0x4b7   :  { %v701_v35 = vmul.f32 %v699_v33, %v696_v32 }
 0x4b9   :  { %v706_v36 = vadd.f32 %v705_v34, %v701_v35 }
 0x4bb   :  { %708 = vrot.lane.b32.xlu1 %v706_v36, %s1425_s27 }
 0x52d   :  { %v709_v37 = vpop.permute.xlu1 %708 }
 0x52e   :  { %711 = vst.msk [vmem:[#allocation11 + $0x1] sm:$0x1] %vm597_vm3, %v709_v37  ;;  %1243 = vmatmul.mubr.msk.f32.vlgmr.msra.gmra.mxu1 %vm92_vm2, %v709_v37 }
 0x52f   :  { %1264 = vmatprep.mubr.msk.f32.mxu1 %vm1423_vm0, %v1422_v0  ;;  %1257 = vmatpush3.msra.mxu1 %v942_v21 }
 0x530   :  { %1258 = vmatprep.subr.mxu1 %v1422_v0 }
 0x531   :  { %1259 = vmatpush3.msra.mxu1 %v941_v22 }
 0x532   :  { %1260 = vmatprep.subr.mxu1 %v1422_v0 }
 0x5ee   :  { %v787_v39 = vpop.f32.mrf.mxu1 }
 0x5ef   :  { %v788_v40 = vadd.f32 %v1098_v38, %v787_v39 }
 0x5f0   :  { %v1244_v41 = vpop.f32.mrf.mxu1 }
 0x5f1   :  { %v791_v42 = vadd.f32 %v788_v40, %v323_v23  ;;  %v940_v23 = vld [vmem:[#allocation7 + $0x88] sm:$0xff] }
 0x5f2   :  { %1261 = vmatpush3.msra.mxu1 %v940_v23 }
 0x5f3   :  { %v1100_v43 = vmul.f32 -1.442695, %v791_v42  ;;  %1262 = vmatprep.subr.mxu1 %v1422_v0  ;;  %v1104_v0 = vld [vmem:[%s1660_s4 + $0x4] sm:$0x1]  ;;  %s1427_s4 = smov [#allocation10]  }
 0x5f4   :  { %1263 = vmatpush3.msra.mxu1 %v939_v24  ;;  %s1058_s1 = sshll.u32 %s1427_s4, 4  ;;  %s1059_s1 = int_to_ptr.vmem [resolvable:$true] %s1058_s1 }
 0x5f5   :  { %1291 = vpow2.f32 %v1100_v43  ;;  %s1369_s21 = scalar_lea.vmem %s1059_s1, 16  ;;  %s1373_s22 = scalar_lea.vmem %s1059_s1, 32 }
 0x5f6   :  { %p1370_p1 = scmp.ne.s32.totalorder %s1059_s1, %s1369_s21  ;;  %p1374_p2 = scmp.lt.s32.totalorder %s1059_s1, %s1059_s1 }
 0x5f7   :  { %p1375_p3 = scmp.lt.s32.totalorder %s1373_s22, %s1369_s21 }
 0x5f9   :  { %p1376_p4 = por %p1375_p3, %p1374_p2 }
 0x5fb   :  { %p1377_p5 = pnand %p1376_p4, %p1370_p1 }
 0x602   :  { %v1292_v44 = vpop.eup %1291 }
 0x603   :  { %v795_v45 = vadd.f32 1.0, %v1292_v44 }
 0x605   :  { %1293 = vrcp.f32 %v795_v45 }
 0x612   :  { %v1294_v46 = vpop.eup %1293 }
 0x613   :  { %v802_v49 = vmul.f32 %v1294_v46, %v800_v47  ;;  %v809_v59 = vsub.f32 1.0, %v1294_v46 }
 0x615   :  { %804 = vrot.lane.b32.xlu1 %v802_v49, %s1424_s0 }
 0x619   :  { %815 = vrot.lane.b32.xlu1 %v253_v48, %s1426_s30 }
 0x61d   :  { %912 = vrot.lane.b32.xlu1 %v403_v51, %s1424_s0 }
 0x687   :  { %v805_v52 = vpop.permute.xlu1 %804 }
 0x688   :  { %v807_v53 = vadd.f32 %v805_v52, %v788_v40 }
 0x68a   :  { %1295 = vtanh.f32 %v807_v53 }
 0x68b   :  { %v816_v48 = vpop.permute.xlu1 %815 }
 0x68c   :  { %v818_v61 = vmul.f32 %v1294_v46, %v816_v48 }
 0x68f   :  { %v913_v14 = vpop.permute.xlu1 %912 }
 0x697   :  { %v1296_v28 = vpop.eup %1295 }
 0x698   :  { %811 = vrot.lane.b32.xlu0 %v1296_v28, %s1425_s27 }
 0x70a   :  { %v812_v60 = vpop.permute.xlu0 %811 }
 0x70b   :  { %v814_v62 = vmul.f32 %v812_v60, %v809_v59 }
 0x70d   :  { %v819_v63 = vadd.f32 %v818_v61, %v814_v62 }
 0x70f   :  { %821 = vrot.lane.b32.xlu0 %v819_v63, %s1425_s27 }
 0x781   :  { %v822_v1 = vpop.permute.xlu0 %821 }
 0x782   :  { %824 = vst.msk [vmem:[#allocation11 + $0x2] sm:$0x1] %vm597_vm3, %v822_v1  ;;  %1254 = vmatmul.mubr.msk.f32.vlgmr.msra.gmra.mxu0 %vm92_vm2, %v822_v1 }
 0x842   :  { %v900_v3 = vpop.f32.mrf.mxu0 }
 0x843   :  { %v901_v4 = vadd.f32 %v1101_v2, %v900_v3 }
 0x844   :  { %v1255_v6 = vpop.f32.mrf.mxu0 }
 0x845   :  { %v904_v7 = vadd.f32 %v901_v4, %v403_v51 }
 0x847   :  { %v1103_v8 = vmul.f32 -1.442695, %v904_v7 }
 0x849   :  { %1297 = vpow2.f32 %v1103_v8 }
 0x856   :  { %v1298_v9 = vpop.eup %1297 }
 0x857   :  { %v908_v12 = vadd.f32 1.0, %v1298_v9 }
 0x859   :  { %1299 = vrcp.f32 %v908_v12 }
 0x866   :  { %v1300_v13 = vpop.eup %1299 }
 0x867   :  { %v915_v15 = vmul.f32 %v1300_v13, %v913_v14  ;;  %v922_v25 = vsub.f32 1.0, %v1300_v13 }
 0x869   :  { %917 = vrot.lane.b32.xlu0 %v915_v15, %s1424_s0 }
 0x86d   :  { %928 = vrot.lane.b32.xlu0 %v333_v16, %s1426_s30 }
 0x871   :  { %1025 = vrot.lane.b32.xlu0 %v483_v18, %s1424_s0 }
 0x8db   :  { %v918_v19 = vpop.permute.xlu0 %917 }
 0x8dc   :  { %v920_v20 = vadd.f32 %v918_v19, %v901_v4 }
 0x8de   :  { %1301 = vtanh.f32 %v920_v20 }
 0x8df   :  { %v929_v5 = vpop.permute.xlu0 %928 }
 0x8e0   :  { %v931_v27 = vmul.f32 %v1300_v13, %v929_v5 }
 0x8e3   :  { %v1026_v39 = vpop.permute.xlu0 %1025 }
 0x8eb   :  { %v1302_v16 = vpop.eup %1301 }
 0x8ec   :  { %924 = vrot.lane.b32.xlu1 %v1302_v16, %s1425_s27 }
 0x95e   :  { %v925_v26 = vpop.permute.xlu1 %924 }
 0x95f   :  { %v927_v29 = vmul.f32 %v925_v26, %v922_v25 }
 0x961   :  { %v932_v30 = vadd.f32 %v931_v27, %v927_v29 }
 0x963   :  { %934 = vrot.lane.b32.xlu1 %v932_v30, %s1425_s27 }
 0x9d5   :  { %v935_v11 = vpop.permute.xlu1 %934 }
 0x9d6   :  { %937 = vst.msk [vmem:[#allocation11 + $0x3] sm:$0x1] %vm597_vm3, %v935_v11  ;;  %1265 = vmatmul.mubr.msk.f32.vlgmr.msra.gmra.mxu1 %vm92_vm2, %v935_v11 }
 0xa96   :  { %v1013_v31 = vpop.f32.mrf.mxu1 }
 0xa97   :  { %v1014_v32 = vadd.f32 %v1104_v0, %v1013_v31 }
 0xa98   :  { %v1266_v33 = vpop.f32.mrf.mxu1 }
 0xa99   :  { %v1017_v34 = vadd.f32 %v1014_v32, %v483_v18 }
 0xa9b   :  { %v1106_v35 = vmul.f32 -1.442695, %v1017_v34 }
 0xa9d   :  { %1303 = vpow2.f32 %v1106_v35 }
 0xaaa   :  { %v1304_v36 = vpop.eup %1303 }
 0xaab   :  { %v1021_v37 = vadd.f32 1.0, %v1304_v36 }
 0xaad   :  { %1305 = vrcp.f32 %v1021_v37 }
 0xaba   :  { %v1306_v38 = vpop.eup %1305 }
 0xabb   :  { %v1028_v40 = vmul.f32 %v1306_v38, %v1026_v39  ;;  %v1035_v45 = vsub.f32 1.0, %v1306_v38 }
 0xabd   :  { %1030 = vrot.lane.b32.xlu1 %v1028_v40, %s1424_s0 }
 0xac1   :  { %1041 = vrot.lane.b32.xlu1 %v413_v55, %s1426_s30 }
 0xb2f   :  { %v1031_v41 = vpop.permute.xlu1 %1030 }
 0xb30   :  { %v1033_v42 = vadd.f32 %v1031_v41, %v1014_v32 }
 0xb32   :  { %1307 = vtanh.f32 %v1033_v42 }
 0xb33   :  { %v1042_v44 = vpop.permute.xlu1 %1041 }
 0xb34   :  { %v1044_v47 = vmul.f32 %v1306_v38, %v1042_v44 }
 0xb3f   :  { %v1308_v43 = vpop.eup %1307 }
 0xb40   :  { %1037 = vrot.lane.b32.xlu0 %v1308_v43, %s1425_s27 }
 0xbb2   :  { %v1038_v46 = vpop.permute.xlu0 %1037 }
 0xbb3   :  { %v1040_v49 = vmul.f32 %v1038_v46, %v1035_v45 }
 0xbb5   :  { %v1045_v50 = vadd.f32 %v1044_v47, %v1040_v49 }
 0xbb7   :  { %1047 = vrot.lane.b32.xlu0 %v1045_v50, %s1425_s27 }
 0xc29   :  { %v1048_v10 = vpop.permute.xlu0 %1047 }
 0xc2a   :  { %1050 = vst.msk [vmem:[#allocation11 + $0x4] sm:$0x1] %vm597_vm3, %v1048_v10  ;;  %1051 = vst.msk [vmem:[#allocation10] sm:$0x1] %vm597_vm3, %v1048_v10 }
 0xc2b   :  { %1380 = shalt.err (!%p1377_p5)
}
 0xc2c   :  { %1061 = dma.vmem_to_hbm [thread:$0]  %s1059_s1, 16, %s1663_s7, [#allocation6]  }
 0xc2d   :  { %s1389_s0 = scalar_lea.vmem %s1069_s2, 128  ;;  %p1394_p7 = scmp.lt.s32.totalorder %s1069_s2, %s1069_s2 }
 0xc2e   :  { %p1390_p6 = scmp.ne.s32.totalorder %s1069_s2, %s1389_s0  ;;  %p1395_p8 = scmp.lt.s32.totalorder %s1389_s0, %s1389_s0 }
 0xc30   :  { %p1396_p9 = por %p1395_p8, %p1394_p7 }
 0xc32   :  { %p1397_p10 = pnand %p1396_p9, %p1390_p6 }
 0xc34   :  { %1400 = shalt.err (!%p1397_p10)
}
 0xc35   :  { %1071 = dma.vmem_to_hbm [thread:$0]  %s1069_s2, 128, %s1664_s8, [#allocation12]  }
 0xc36   :  { %1413 = dma.done.wait [#allocation6], 16  }
 0xc37   :  { %1414 = vsyncadd [#allocation6], 4294967280 }
 0xc38   :  { %1415 = dma.done.wait [#allocation12], 128  }
 0xc39   :  { %1416 = vsyncadd [#allocation12], 4294967168 }
 0xc3a   :  { %1078 = vsyncpa [#allocation5], 1 }
 0xc3b   :  { %1079 = vsyncpa [#allocation8], 1 }
 0xc3c   :  { %1080 = vsyncpa [#allocation6], 1 }
 0xc3d   :  { %1081 = vsyncpa [#allocation12], 1 }

</bundles_post_ra>
